<compile_context>
chip_gen: v7x
topology: tpu7x:2x2x1
jax: 0.10.0
libtpu: 0.0.40
codegen_flags: <defaults>
</compile_context>

<pallas_src>
import functools

import jax
import jax.numpy as jnp
from jax.experimental import pallas as pl
from jax.experimental.pallas import tpu as pltpu

_LANE = 128


def _round_up_to_lanes(n: int) -> int:
    return ((n + _LANE - 1) // _LANE) * _LANE


def _vmem_bytes_estimate(tb, T, C, Kp, Lp, L):
    """Rough per-step f32 VMEM footprint (double-buffered I/O + temporaries)."""
    rows = tb * T
    io = 2 * (rows * C + rows + tb * L * Kp + tb * L * T)      # 2x: double buffer
    weights = 2 * (C * Kp + Kp + Kp * Lp + Lp)
    temps = rows * Kp + 2 * rows * Lp + 2 * tb * Lp + rows * L \
        + tb * L * Kp + tb * L * T
    return 4 * (io + weights + temps)


def _choose_batch_tile(B, T, C, Kp, Lp, L,
                       budget_bytes=8 * 1024 * 1024, max_rows=1024):
    """Largest divisor of B whose per-step block fits the VMEM budget."""
    best = 1
    for tb in range(1, B + 1):
        if B % tb:
            continue
        if tb * T > max_rows:
            continue
        if _vmem_bytes_estimate(tb, T, C, Kp, Lp, L) <= budget_bytes:
            best = tb
    return best


def _dot_attention_kernel(TB, T, L, mxu_dtype,
                          x_ref, bias_ref, wc_ref, bc_ref, wp_ref, bp_ref,
                          out_ref, alpha_ref):
    """One batch-tile of the DotAttention forward.

    x_ref:     (TB*T, C)   flattened context rows for this tile
    bias_ref:  (TB*T, 1)   additive mask bias: 0 (valid) / -1e6 (masked)
    wc_ref:    (C,  Kp)    ctxt_proj weight, lane-padded
    bc_ref:    (1,  Kp)
    wp_ref:    (Kp, Lp)    proj_to_label_space weight, lane-padded
    bp_ref:    (1,  Lp)
    out_ref:   (TB, L, Kp) attention-weighted embeddings (lane-padded K)
    alpha_ref: (TB, L, T)  attention weights, already in module output layout
    """
    Kp = wc_ref.shape[1]
    Lp = wp_ref.shape[1]

    x = x_ref[...]                                              # (TB*T, C) f32

    # Matmul 1: ctxt_proj over all rows of this tile (M = TB*T on the MXU).
    enc = jnp.dot(x.astype(mxu_dtype), wc_ref[...].astype(mxu_dtype),
                  preferred_element_type=jnp.float32) + bc_ref[...]      # (TB*T, Kp)

    # Matmul 2: proj_to_label_space.
    logits = jnp.dot(enc.astype(mxu_dtype), wp_ref[...].astype(mxu_dtype),
                     preferred_element_type=jnp.float32) + bp_ref[...]   # (TB*T, Lp)

    # Additive mask bias (one broadcast VALU add). Masked rows get -1e6, whose
    # exp underflows to exactly 0 in f32 -> identical softmax to the torch
    # compare/select formulation (each sequence has >= 1 valid token).
    logits = logits + bias_ref[...]

    # Numerically stable softmax over the sequence axis, per sequence (f32).
    logits3 = logits.reshape(TB, T, Lp)
    m = jnp.max(logits3, axis=1, keepdims=True)                 # (TB, 1, Lp)
    e = jnp.exp(logits3 - m)                                    # (TB, T, Lp)
    s = jnp.sum(e, axis=1, keepdims=True)                       # (TB, 1, Lp)
    # EUP approximate reciprocal + one Newton refinement (no vector divide).
    inv = pl.reciprocal(s, approx=True)
    inv = inv * (2.0 - s * inv)
    alpha3 = e * inv                                            # (TB, T, Lp)

    # NOTE: padded Lp columns of alpha3 are NOT zero (softmax of zero logits);
    # the :L slice below is required for correctness.
    alpha_l = alpha3[:, :, :L]                                  # (TB, T, L)
    enc3 = enc.reshape(TB, T, Kp)                               # (TB, T, Kp)

    # Weighted context: contract T directly (no transposed MXU operand).
    out_ref[...] = jnp.einsum("btl,btk->blk",
                              alpha_l.astype(mxu_dtype),
                              enc3.astype(mxu_dtype),
                              preferred_element_type=jnp.float32)  # (TB, L, Kp)

    # Alphas in the module's (B, L, T) layout, written straight from the
    # kernel (no Lp-padded slab, no wrapper transpose).
    alpha_ref[...] = jnp.transpose(alpha_l, (0, 2, 1))          # (TB, L, T)


@functools.partial(jax.jit, static_argnames=("batch_tile", "mxu_dtype"))
def dot_attention(context, mask, wc, bc, wp, bp, *,
                  batch_tile=None, mxu_dtype=jnp.float32):
    """DotAttention forward.

    context: (B, T, C) f32; mask: (B, T) in {0,1}; wc: (C, K); bc: (1, K);
    wp: (K, L); bp: (1, L).
    Returns (outputs (B, L, K), alphas (B, L, T)).
    """
    B, T, C = context.shape
    K = wc.shape[1]
    L = wp.shape[1]
    Kp = _round_up_to_lanes(K)
    Lp = _round_up_to_lanes(L)

    if batch_tile is None:
        batch_tile = _choose_batch_tile(B, T, C, Kp, Lp, L)
    TB = int(batch_tile)
    if B % TB != 0:
        raise ValueError(f"batch_tile={TB} must divide batch={B}")
    nb = B // TB

    # Zero-pad the projection output dims so the in-kernel matmul results and
    # the outputs slab are 128-lane dense (padded K columns of enc/out are
    # exactly zero and are sliced off below).
    wc_p = jnp.pad(wc, ((0, 0), (0, Kp - K)))
    bc_p = jnp.pad(bc, ((0, 0), (0, Kp - K)))
    wp_p = jnp.pad(wp, ((0, Kp - K), (0, Lp - L)))
    bp_p = jnp.pad(bp, ((0, 0), (0, Lp - L)))

    x2d = context.reshape(B * T, C)
    # Additive mask bias: 0 for valid tokens, -1e6 for masked tokens.
    bias2d = ((mask.astype(jnp.float32) - 1.0) * 1.0e6).reshape(B * T, 1)

    kernel = functools.partial(_dot_attention_kernel, TB, T, L, mxu_dtype)

    rows = TB * T
    vmem_limit = min(max(2 * _vmem_bytes_estimate(TB, T, C, Kp, Lp, L),
                         16 * 1024 * 1024),
                     48 * 1024 * 1024)

    grid_spec = pltpu.PrefetchScalarGridSpec(
        num_scalar_prefetch=0,
        grid=(nb,),                                   # TB sequences per step
        in_specs=[
            pl.BlockSpec((rows, C), lambda i: (i, 0)),    # context rows
            pl.BlockSpec((rows, 1), lambda i: (i, 0)),    # mask bias rows
            pl.BlockSpec((C, Kp), lambda i: (0, 0)),      # Wc (resident)
            pl.BlockSpec((1, Kp), lambda i: (0, 0)),      # bc
            pl.BlockSpec((Kp, Lp), lambda i: (0, 0)),     # Wp (resident)
            pl.BlockSpec((1, Lp), lambda i: (0, 0)),      # bp
        ],
        out_specs=[
            pl.BlockSpec((TB, L, Kp), lambda i: (i, 0, 0)),  # outputs (pad K)
            pl.BlockSpec((TB, L, T), lambda i: (i, 0, 0)),   # alphas (B, L, T)
        ],
    )

    out_pad, alphas = pl.pallas_call(
        kernel,
        out_shape=(
            jax.ShapeDtypeStruct((B, L, Kp), jnp.float32),
            jax.ShapeDtypeStruct((B, L, T), jnp.float32),
        ),
        grid_spec=grid_spec,
        compiler_params=pltpu.CompilerParams(
            dimension_semantics=("parallel",),        # v7x megacore over batch
            vmem_limit_bytes=int(vmem_limit)),
    )(x2d, bias2d, wc_p, bc_p, wp_p, bp_p)

    outputs = out_pad[:, :, :K]                       # (B, L, K)
    return outputs, alphas


def _reference(context, mask, wc, bc, wp, bp):
    """Pure-JAX mirror of the PyTorch forward for validation."""
    enc = context @ wc + bc                               # (B, T, K)
    logits = enc @ wp + bp                                # (B, T, L)
    fm = mask.astype(jnp.float32)[:, :, None]             # (B, T, 1)
    logits = fm * logits + (-1000000.0) * (1.0 - fm)
    alpha = jax.nn.softmax(logits, axis=1)                # softmax over T
    alpha = jnp.transpose(alpha, (0, 2, 1))               # (B, L, T)
    outputs = jnp.einsum("blt,btk->blk", alpha, enc)      # (B, L, K)
    return outputs, alpha


if __name__ == "__main__":
    # Keep the pure-JAX reference at full f32 matmul precision so the only
    # kernel-vs-reference delta (f32 path) is the Newton-refined reciprocal.
    jax.config.update("jax_default_matmul_precision", "highest")

    # Small shapes consistent with the module:
    #   batch=4, T (seq)=8, ctxt_emb_size=32, key_emb_size=32, num_labels=4
    B, T, C, K, L = 4, 8, 32, 32, 4

    key = jax.random.PRNGKey(0)
    k_ctx, k_mask, k_wc, k_bc, k_wp, k_bp = jax.random.split(key, 6)

    context = jax.random.normal(k_ctx, (B, T, C), dtype=jnp.float32)
    # LongTensor mask in torch; 0/1 ints cast to float (as .float() does).
    mask_int = jax.random.bernoulli(k_mask, p=0.7, shape=(B, T)).astype(jnp.int32)
    mask_int = mask_int.at[:, 0].set(1)  # ensure each sequence has a valid token
    mask = mask_int.astype(jnp.float32)

    # Deterministic nn.Linear-style init, stored transposed as (in, out).
    bound_c = 1.0 / (C ** 0.5)
    bound_p = 1.0 / (K ** 0.5)
    wc = jax.random.uniform(k_wc, (C, K), jnp.float32, -bound_c, bound_c)
    bc = jax.random.uniform(k_bc, (1, K), jnp.float32, -bound_c, bound_c)
    wp = jax.random.uniform(k_wp, (K, L), jnp.float32, -bound_p, bound_p)
    bp = jax.random.uniform(k_bp, (1, L), jnp.float32, -bound_p, bound_p)

    ref_out, ref_alpha = _reference(context, mask, wc, bc, wp, bp)

    # 1) Exact f32 MXU path, explicit batch tile of 2 -> grid=(2,) exercises
    #    the double-buffered / "parallel" batch pipeline.
    outputs, alphas = dot_attention(context, mask, wc, bc, wp, bp,
                                    batch_tile=2, mxu_dtype=jnp.float32)
    jax.block_until_ready((outputs, alphas))
    assert outputs.shape == (B, L, K) and alphas.shape == (B, L, T)
    # 1e-4 tolerance covers the Newton-refined approximate reciprocal.
    assert jnp.allclose(outputs, ref_out, atol=1e-4, rtol=1e-4)
    assert jnp.allclose(alphas, ref_alpha, atol=1e-4, rtol=1e-4)

    # 2) bf16 MXU-operand path (production lever on v6e/v7x), auto batch tile.
    outputs_bf, alphas_bf = dot_attention(context, mask, wc, bc, wp, bp,
                                          mxu_dtype=jnp.bfloat16)
    jax.block_until_ready((outputs_bf, alphas_bf))
    assert outputs_bf.shape == (B, L, K) and alphas_bf.shape == (B, L, T)
    # Loose tolerance: bf16 operand rounding (accumulation stays f32).
    assert jnp.allclose(outputs_bf, ref_out, atol=5e-2, rtol=5e-2)
    assert jnp.allclose(alphas_bf, ref_alpha, atol=5e-2, rtol=5e-2)

    print("KERNEL_OK")
</pallas_src>

<mosaic_0001>
module attributes {stable_mosaic.version = 11 : i64} {
  func.func @_dot_attention_kernel(%arg0: i32, %arg1: memref<16x32xf32, #tpu.memory_space<vmem>>, %arg2: memref<16x1xf32, #tpu.memory_space<vmem>>, %arg3: memref<32x128xf32, #tpu.memory_space<vmem>>, %arg4: memref<1x128xf32, #tpu.memory_space<vmem>>, %arg5: memref<128x128xf32, #tpu.memory_space<vmem>>, %arg6: memref<1x128xf32, #tpu.memory_space<vmem>>, %arg7: memref<2x4x128xf32, #tpu.memory_space<vmem>>, %arg8: memref<2x4x8xf32, #tpu.memory_space<vmem>>) attributes {dimension_semantics = [#tpu.dimension_semantics<parallel>], iteration_bounds = array<i64: 2>, scalar_prefetch = 0 : i64, scratch_operands = 0 : i64, tpu.core_type = #tpu.core_type<tc>, window_params = [{transform_indices = @transform_0, window_bounds = array<i64: 16, 32>}, {transform_indices = @transform_1, window_bounds = array<i64: 16, 1>}, {pipeline_mode = #tpu.pipeline_mode<synchronous>, transform_indices = @transform_2, window_bounds = array<i64: 32, 128>}, {pipeline_mode = #tpu.pipeline_mode<synchronous>, transform_indices = @transform_3, window_bounds = array<i64: 1, 128>}, {pipeline_mode = #tpu.pipeline_mode<synchronous>, transform_indices = @transform_4, window_bounds = array<i64: 128, 128>}, {pipeline_mode = #tpu.pipeline_mode<synchronous>, transform_indices = @transform_5, window_bounds = array<i64: 1, 128>}, {transform_indices = @transform_6, window_bounds = array<i64: 2, 4, 128>}, {transform_indices = @transform_7, window_bounds = array<i64: 2, 4, 8>}]} {
    %c0 = arith.constant 0 : index
    %c0_0 = arith.constant 0 : index
    %0 = vector.load %arg1[%c0, %c0_0] : memref<16x32xf32, #tpu.memory_space<vmem>>, vector<16x32xf32>
    %c0_1 = arith.constant 0 : index
    %c0_2 = arith.constant 0 : index
    %1 = vector.load %arg3[%c0_1, %c0_2] : memref<32x128xf32, #tpu.memory_space<vmem>>, vector<32x128xf32>
    %cst = arith.constant dense<0.000000e+00> : vector<16x128xf32>
    %2 = tpu.matmul %0, %1, %cst {dimension_numbers = #tpu.dot_dimension_numbers<[1], [0], [0], [1], [0, 0, 1, 1], [], []>, precision = #tpu.contract_precision<fp32>} : vector<16x32xf32>, vector<32x128xf32>, vector<16x128xf32> -> vector<16x128xf32>
    %c0_3 = arith.constant 0 : index
    %c0_4 = arith.constant 0 : index
    %3 = vector.load %arg4[%c0_3, %c0_4] : memref<1x128xf32, #tpu.memory_space<vmem>>, vector<1x128xf32>
    %4 = vector.broadcast %3 : vector<1x128xf32> to vector<16x128xf32>
    %5 = arith.addf %2, %4 : vector<16x128xf32>
    %c0_5 = arith.constant 0 : index
    %c0_6 = arith.constant 0 : index
    %6 = vector.load %arg5[%c0_5, %c0_6] : memref<128x128xf32, #tpu.memory_space<vmem>>, vector<128x128xf32>
    %cst_7 = arith.constant dense<0.000000e+00> : vector<16x128xf32>
    %7 = tpu.matmul %5, %6, %cst_7 {dimension_numbers = #tpu.dot_dimension_numbers<[1], [0], [0], [1], [0, 0, 1, 1], [], []>, precision = #tpu.contract_precision<fp32>} : vector<16x128xf32>, vector<128x128xf32>, vector<16x128xf32> -> vector<16x128xf32>
    %c0_8 = arith.constant 0 : index
    %c0_9 = arith.constant 0 : index
    %8 = vector.load %arg6[%c0_8, %c0_9] : memref<1x128xf32, #tpu.memory_space<vmem>>, vector<1x128xf32>
    %9 = vector.broadcast %8 : vector<1x128xf32> to vector<16x128xf32>
    %10 = arith.addf %7, %9 : vector<16x128xf32>
    %c0_10 = arith.constant 0 : index
    %c0_11 = arith.constant 0 : index
    %11 = vector.load %arg2[%c0_10, %c0_11] : memref<16x1xf32, #tpu.memory_space<vmem>>, vector<16x1xf32>
    %12 = vector.broadcast %11 : vector<16x1xf32> to vector<16x128xf32>
    %13 = arith.addf %10, %12 : vector<16x128xf32>
    %14 = vector.shape_cast %13 : vector<16x128xf32> to vector<2x8x128xf32>
    %cst_12 = arith.constant dense<0xFF800000> : vector<2x128xf32>
    %15 = vector.multi_reduction <maximumf>, %14, %cst_12 [1] : vector<2x8x128xf32> to vector<2x128xf32>
    %16 = vector.shape_cast %15 : vector<2x128xf32> to vector<2x1x128xf32>
    %17 = vector.broadcast %16 : vector<2x1x128xf32> to vector<2x8x128xf32>
    %18 = arith.subf %14, %17 : vector<2x8x128xf32>
    %19 = math.exp %18 : vector<2x8x128xf32>
    %cst_13 = arith.constant dense<0.000000e+00> : vector<2x128xf32>
    %20 = vector.multi_reduction <add>, %19, %cst_13 [1] : vector<2x8x128xf32> to vector<2x128xf32>
    %21 = vector.shape_cast %20 : vector<2x128xf32> to vector<2x1x128xf32>
    %22 = tpu.reciprocal %21 {approx = true} : vector<2x1x128xf32> -> vector<2x1x128xf32>
    %23 = arith.mulf %21, %22 : vector<2x1x128xf32>
    %cst_14 = arith.constant 2.000000e+00 : f32
    %24 = vector.broadcast %cst_14 : f32 to vector<2x1x128xf32>
    %25 = arith.subf %24, %23 : vector<2x1x128xf32>
    %26 = arith.mulf %22, %25 : vector<2x1x128xf32>
    %27 = vector.broadcast %26 : vector<2x1x128xf32> to vector<2x8x128xf32>
    %28 = arith.mulf %19, %27 : vector<2x8x128xf32>
    %29 = vector.extract_strided_slice %28 {offsets = [0, 0, 0], sizes = [2, 8, 4], strides = [1, 1, 1]} : vector<2x8x128xf32> to vector<2x8x4xf32>
    %30 = vector.shape_cast %5 : vector<16x128xf32> to vector<2x8x128xf32>
    "tpu.trace_start"() <{level = 10 : i32, message = "btl,btk->blk"}> : () -> ()
    %cst_15 = arith.constant dense<0.000000e+00> : vector<2x4x128xf32>
    %31 = tpu.matmul %29, %30, %cst_15 {dimension_numbers = #tpu.dot_dimension_numbers<[1], [1], [2], [2], [0, 0, 0, 2, 1, 2], [0], [0]>, precision = #tpu.contract_precision<fp32>} : vector<2x8x4xf32>, vector<2x8x128xf32>, vector<2x4x128xf32> -> vector<2x4x128xf32>
    "tpu.trace_stop"() : () -> ()
    %c0_16 = arith.constant 0 : index
    %c0_17 = arith.constant 0 : index
    %c0_18 = arith.constant 0 : index
    %32 = vector.load %arg7[%c0_16, %c0_17, %c0_18] : memref<2x4x128xf32, #tpu.memory_space<vmem>>, vector<2x4x128xf32>
    tpu.vector_store %arg7[%c0_16, %c0_17, %c0_18], %31 {strides = array<i32>} : memref<2x4x128xf32, #tpu.memory_space<vmem>>, vector<2x4x128xf32>,
    %33 = tpu.transpose %29, [0, 2, 1] : vector<2x8x4xf32> -> vector<2x4x8xf32>
    %c0_19 = arith.constant 0 : index
    %c0_20 = arith.constant 0 : index
    %c0_21 = arith.constant 0 : index
    %34 = vector.load %arg8[%c0_19, %c0_20, %c0_21] : memref<2x4x8xf32, #tpu.memory_space<vmem>>, vector<2x4x8xf32>
    tpu.vector_store %arg8[%c0_19, %c0_20, %c0_21], %33 {strides = array<i32>} : memref<2x4x8xf32, #tpu.memory_space<vmem>>, vector<2x4x8xf32>,
    return
  }
  func.func @transform_0(%arg0: i32) -> (i32, i32) {
    %c0_i32 = arith.constant 0 : i32
    %c0_i32_0 = arith.constant 0 : i32
    return %arg0, %c0_i32 : i32, i32
  }
  func.func @transform_1(%arg0: i32) -> (i32, i32) {
    %c0_i32 = arith.constant 0 : i32
    %c0_i32_0 = arith.constant 0 : i32
    return %arg0, %c0_i32 : i32, i32
  }
  func.func @transform_2(%arg0: i32) -> (i32, i32) {
    %c0_i32 = arith.constant 0 : i32
    %c0_i32_0 = arith.constant 0 : i32
    %c0_i32_1 = arith.constant 0 : i32
    return %c0_i32, %c0_i32_0 : i32, i32
  }
  func.func @transform_3(%arg0: i32) -> (i32, i32) {
    %c0_i32 = arith.constant 0 : i32
    %c0_i32_0 = arith.constant 0 : i32
    %c0_i32_1 = arith.constant 0 : i32
    return %c0_i32, %c0_i32_0 : i32, i32
  }
  func.func @transform_4(%arg0: i32) -> (i32, i32) {
    %c0_i32 = arith.constant 0 : i32
    %c0_i32_0 = arith.constant 0 : i32
    %c0_i32_1 = arith.constant 0 : i32
    return %c0_i32, %c0_i32_0 : i32, i32
  }
  func.func @transform_5(%arg0: i32) -> (i32, i32) {
    %c0_i32 = arith.constant 0 : i32
    %c0_i32_0 = arith.constant 0 : i32
    %c0_i32_1 = arith.constant 0 : i32
    return %c0_i32, %c0_i32_0 : i32, i32
  }
  func.func @transform_6(%arg0: i32) -> (i32, i32, i32) {
    %c0_i32 = arith.constant 0 : i32
    %c0_i32_0 = arith.constant 0 : i32
    %c0_i32_1 = arith.constant 0 : i32
    return %arg0, %c0_i32, %c0_i32_0 : i32, i32, i32
  }
  func.func @transform_7(%arg0: i32) -> (i32, i32, i32) {
    %c0_i32 = arith.constant 0 : i32
    %c0_i32_0 = arith.constant 0 : i32
    %c0_i32_1 = arith.constant 0 : i32
    return %arg0, %c0_i32, %c0_i32_0 : i32, i32, i32
  }
}

</mosaic_0001>

<bundles_post_ra>
// kernel: dot_attention.1
= control target key start
LH: loop header
LB: loop body
LE: loop exit
PB: predicated region body
PF: predicated region fallthrough
CT: control target
= control target key end

     0   :  { %13 = vsyncpa [#allocation3], 0  ;;  %s4462_s0 = inlined_call_operand.vmem [shape: f32[32,32], index: 0, kind: input, shape index: {}]   ;;  %s4463_s1 = inlined_call_operand.vmem [shape: f32[32,1], index: 1, kind: input, shape index: {}]   ;;  %s4464_s2 = inlined_call_operand.vmem [shape: f32[32,128], index: 2, kind: input, shape index: {}]   ;;  %s4465_s3 = inlined_call_operand.vmem [shape: f32[1,128], index: 3, kind: input, shape index: {}]   ;;  %s4466_s4 = inlined_call_operand.vmem [shape: f32[128,128], index: 4, kind: input, shape index: {}]   ;;  %s4467_s5 = inlined_call_operand.vmem [shape: f32[1,128], index: 5, kind: input, shape index: {}]   ;;  %s4468_s6 = inlined_call_operand.hbm [shape: f32[4,4,128], index: 6, kind: output, shape index: {0}]   ;;  %s4469_s7 = inlined_call_operand.hbm [shape: f32[4,4,8], index: 7, kind: output, shape index: {1}]  }
   0x1   :  { %15 = vsyncpa [#allocation3 + $0x1], 0 }
   0x2   :  { %16 = vsyncpa [#allocation5], 0 }
   0x3   :  { %18 = vsyncpa [#allocation5 + $0x1], 0  ;;  %s3743_s24 = smov 0   ;;  %s3745_s25 = smov 0  }
   0x4   :  { %s3747_s26 = smov 0   ;;  %s3749_s27 = smov 0  }
   0x5 LB: > { %s3764_s28 = sadd.s32 4294967295, %s3694_s27   ;;  %s2732_s29 = sadd.s32 4294967294, %s3694_s27   ;;  %s3694_s27 = sphi %s3749_s27, %s4519_s27   ;;  %s3690_s26 = sphi %s3747_s26, %s4518_s26   ;;  %s3686_s25 = sphi %s3745_s25, %s4517_s25   ;;  %s3682_s24 = sphi %s3743_s24, %s4516_s24  }
   0x6   : > { %s3768_s30 = sadd.s32 1, %s3694_s27   ;;  %s167_s8 = sadd.s32 1, %s3690_s26 }
   0x7   : > { %s164_s9 = ssub.s32 %s3694_s27, %s3768_s30  ;;  %p177_p0 = scmp.ne.s32.totalorder %s3690_s26, %s3686_s25 }
   0x8   : > { %p165_p1 = scmp.eq.s32.totalorder %s164_s9, 0  ;;  %p178_p2 = scmp.eq.s32.totalorder %s3764_s28, 1 }
   0x9   : > { %p183_p3 = scmp.ne.s32.totalorder %s3686_s25, %s3682_s24  ;;  %p184_p4 = scmp.eq.s32.totalorder %s2732_s29, 1 }
   0xa   : > { %s3779_s10 = scalar_select %p165_p1, %s3690_s26, %s167_s8  }
   0xb   : > { %p3781_p5 = por %p178_p2, %p177_p0  ;;  %p3785_p6 = por %p184_p4, %p183_p3 }
   0xc   : > { %p2735_p7 = scmp.ge.s32.totalorder %s3694_s27, 1  ;;  %p258_p8 = scmp.lt.s32.totalorder %s3694_s27, 3 }
   0xe   : > { %p259_p9 = pnand %p2735_p7, %p258_p8 }
   0xf   : > { %v316_v0 = vld [vmem:[%s4464_s2] sm:$0xff] (!%p259_p9)  ;;  %v317_v1 = vld [vmem:[%s4464_s2 + $0x8] sm:$0xff] (!%p259_p9)  ;;  %v318_v2 = vld [vmem:[%s4464_s2 + $0x10] sm:$0xff] (!%p259_p9)  ;;  %s2738_s19 = sshll.u32 (!%p259_p9), %s3764_s28, 1  ;;  %vm327_vm0 = vcmask (!%p259_p9), 261120   ;;  %vm3698_vm1 = vmmov (!%p259_p9), 0  }
  0x10   : > { %262 = sbr.rel (%p259_p9) target bundleno = 1150 (0x47e), region = 44  ;;  %v335_v3 = vand.u32 (!%p259_p9), 4294901760, %v316_v0  ;;  %v338_v4 = vand.u32 (!%p259_p9), 4294901760, %v317_v1  ;;  %v319_v5 = vld [vmem:[%s4464_s2 + $0x18] sm:$0xff] (!%p259_p9)  ;;  %v341_v6 = vand.u32 (!%p259_p9), 4294901760, %v318_v2  ;;  %p301_p10 = scmp.lt.s32.totalorder (!%p259_p9), %s2738_s19, 3 }
  0x11   : > { %v3807_v7 = vld [vmem:[%s4466_s4] sm:$0xff] (!%p259_p9)  ;;  %v344_v8 = vand.u32 (!%p259_p9), 4294901760, %v319_v5  ;;  %v3823_v14 = vld [vmem:[%s4466_s4 + $0x8] sm:$0xff] (!%p259_p9)  ;;  %v3864_v32 = vld [vmem:[%s4466_s4 + $0x10] sm:$0xff] (!%p259_p9)  ;;  %s4315_s13 = sand.u32 (!%p259_p9), 1, %s3686_s25   ;;  %vm1655_vm2 = vcmask (!%p259_p9), 64512  }
  0x12   : > { %v886_v9 = vand.u32 (!%p259_p9), 4294901760, %v3807_v7  ;;  %v3810_v10 = vpack.c.bf16 (!%p259_p9), %v338_v4, %v335_v3  ;;  %v3814_v11 = vsub.f32 (!%p259_p9), %v316_v0, %v335_v3  ;;  %v3816_v12 = vsub.f32 (!%p259_p9), %v317_v1, %v338_v4  ;;  %v3873_v37 = vld [vmem:[%s4466_s4 + $0x18] sm:$0xff] (!%p259_p9)  ;;  %v3887_v40 = vld [vmem:[%s4466_s4 + $0x20] sm:$0xff] (!%p259_p9)  ;;  %v3899_v45 = vld [vmem:[%s4466_s4 + $0x28] sm:$0xff] (!%p259_p9)  ;;  %s2736_s14 = sshll.u32 (!%p259_p9), %s4315_s13, 3  ;;  %s2752_s17 = sshll.u32 (!%p259_p9), %s3764_s28, 7 }
  0x13   : > { %v3818_v13 = vsub.f32 (!%p259_p9), %v318_v2, %v341_v6  ;;  %v3825_v15 = vpack.c.bf16 (!%p259_p9), %v344_v8, %v341_v6  ;;  %v3827_v16 = vsub.f32 (!%p259_p9), %v319_v5, %v344_v8  ;;  %v889_v22 = vand.u32 (!%p259_p9), 4294901760, %v3823_v14  ;;  %v3935_v62 = vld [vmem:[%s4466_s4 + $0x30] sm:$0xff] (!%p259_p9)  ;;  %v3946_v3 = vld [vmem:[%s4466_s4 + $0x38] sm:$0xff] (!%p259_p9)  ;;  %v3951_v4 = vld [vmem:[%s4466_s4 + $0x40] sm:$0xff] (!%p259_p9)  ;;  %s4378_s21 = scalar_lea.hbm (!%p259_p9), %s4469_s7, %s2752_s17  ;;  %s2597_s22 = scalar_lea.sflag (!%p259_p9), [#allocation5], %s4315_s13 }
  0x14   : > { %v3832_v17 = vsub.f32 (!%p259_p9), %v3807_v7, %v886_v9  ;;  %3259 = vmatprep.subr.bf16.mxu0 (!%p259_p9), %v3810_v10  ;;  %v426_v18 = vand.u32 (!%p259_p9), 4294901760, %v3814_v11  ;;  %v433_v19 = vand.u32 (!%p259_p9), 4294901760, %v3816_v12  ;;  %v892_v44 = vand.u32 (!%p259_p9), 4294901760, %v3864_v32  ;;  %s3699_s29 = smov (!%p259_p9), [#allocation4]  }
  0x15   : > { %v440_v20 = vand.u32 (!%p259_p9), 4294901760, %v3818_v13  ;;  %3261 = vmatpush3.bf16.msra.mxu0 (!%p259_p9), %v3810_v10  ;;  %v447_v21 = vand.u32 (!%p259_p9), 4294901760, %v3827_v16  ;;  %v3882_v39 = vsub.f32 (!%p259_p9), %v3823_v14, %v889_v22  ;;  %v4490_v49 = vand.u32 (!%p259_p9), 4294901760, %v3873_v37 }
  0x16   : > { %v4475_v23 = vand.u32 (!%p259_p9), 4294901760, %v3832_v17  ;;  %3263 = vmatprep.subr.bf16.mxu0 (!%p259_p9), %v3825_v15  ;;  %v427_v26 = vsub.f32 (!%p259_p9), %v3814_v11, %v426_v18  ;;  %v434_v27 = vsub.f32 (!%p259_p9), %v3816_v12, %v433_v19  ;;  %v3908_v52 = vsub.f32 (!%p259_p9), %v3864_v32, %v892_v44 }
  0x17   : > { %s4521_s19 = smov (!%p301_p10, %s2738_s19), 3  ;;  %v441_v30 = vsub.f32 %v3818_v13, %v440_v20  ;;  %v448_v31 = vsub.f32 %v3827_v16, %v447_v21  ;;  %v4474_v48 = vand.u32 4294901760, %v3882_v39  ;;  %v4489_v53 = vand.u32 4294901760, %v3887_v40 }
  0x18   : > { %s2739_s9 = sshll.u32 %s4521_s19, 3  ;;  %v428_v35 = vand.u32 4294901760, %v427_v26  ;;  %v435_v36 = vand.u32 4294901760, %v434_v27  ;;  %v990_v38 = vsub.f32 %v3832_v17, %v4475_v23  ;;  %v3917_v56 = vsub.f32 %v3873_v37, %v4490_v49 }
  0x19   : > { %s304_s15 = scalar_lea.vmem %s4462_s0, %s2739_s9  ;;  %3265 = vmatpush3.bf16.msra.mxu0 %v3825_v15  ;;  %v442_v46 = vand.u32 4294901760, %v441_v30  ;;  %v449_v47 = vand.u32 4294901760, %v448_v31  ;;  %v997_v55 = vsub.f32 %v3882_v39, %v4474_v48  ;;  %v4487_v57 = vand.u32 4294901760, %v3899_v45  ;;  %v4021_v48 = vld [vmem:[%s4466_s4 + $0x68] sm:$0xff]  ;;  %s310_s8 = scalar_lea.vmem %s4463_s1, %s2739_s9 }
  0x1a   : > { %v314_v24 = vld [vmem:[%s304_s15] sm:$0xff]  ;;  %v315_v25 = vld [vmem:[%s304_s15 + $0x8] sm:$0xff]  ;;  %v3266_v42 = vpack.c.bf16 %v435_v36, %v428_v35  ;;  %v991_v54 = vand.u32 4294901760, %v990_v38  ;;  %v4473_v60 = vand.u32 4294901760, %v3908_v52  ;;  %v3930_v61 = vsub.f32 %v3887_v40, %v4489_v53  ;;  %s4321_s15 = scalar_lea.vmem [#allocation4], %s2736_s14 }
  0x1b   : > { %v329_v28 = vsel %vm327_vm0, %v314_v24, 0  ;;  %v332_v29 = vsel %vm327_vm0, %v315_v25, 0  ;;  %v3270_v63 = vpack.c.bf16 %v449_v47, %v442_v46  ;;  %v998_v0 = vand.u32 4294901760, %v997_v55  ;;  %v3960_v25 = vld [vmem:[%s4466_s4 + $0x48] sm:$0xff]  ;;  %v3984_v55 = vld [vmem:[%s4466_s4 + $0x50] sm:$0xff]  ;;  %s2626_s16 = sshll.u32 %s4321_s15, 4  ;;  %s4370_s16 = int_to_ptr.vmem [resolvable:$true] %s2626_s16 }
  0x1c   : > { %v3866_v33 = vand.u32 4294901760, %v329_v28  ;;  %v3868_v34 = vand.u32 4294901760, %v332_v29  ;;  %3267 = vmatprep.subr.bf16.mxu0 %v3266_v42  ;;  %v4472_v1 = vand.u32 4294901760, %v3917_v56  ;;  %v3941_v2 = vsub.f32 %v3899_v45, %v4487_v57  ;;  %s3600_s23 = scalar_lea.vmem %s4370_s16, 128 }
  0x1d   : > { %v1004_v8 = vsub.f32 %v3908_v52, %v4473_v60  ;;  %v4471_v24 = vand.u32 4294901760, %v3930_v61  ;;  %v3338_v26 = vpack.c.bf16 %v998_v0, %v991_v54  ;;  %v4481_v35 = vand.u32 4294901760, %v3946_v3  ;;  %p3601_p11 = scmp.ne.s32.totalorder %s4370_s16, %s3600_s23 }
  0x1e   : > { %v3890_v41 = vsub.f32 %v329_v28, %v3866_v33  ;;  %v3893_v43 = vsub.f32 %v332_v29, %v3868_v34  ;;  %v1011_v27 = vsub.f32 %v3917_v56, %v4472_v1  ;;  %v4470_v28 = vand.u32 4294901760, %v3941_v2 }
  0x1f   : > { %v4483_v29 = vand.u32 4294901760, %v3935_v62  ;;  %v1005_v30 = vand.u32 4294901760, %v1004_v8  ;;  %v1018_v31 = vsub.f32 %v3930_v61, %v4471_v24  ;;  %v4477_v36 = vand.u32 4294901760, %v3951_v4  ;;  %3339 = vmatprep.subr.bf16.mxu1 %v3338_v26  ;;  %p3602_p12 = pnand %p3601_p11, %p3781_p5 }
  0x20   : > { %v405_v50 = vand.u32 4294901760, %v3890_v41  ;;  %v415_v51 = vand.u32 4294901760, %v3893_v43  ;;  %v1012_v38 = vand.u32 4294901760, %v1011_v27  ;;  %v1025_v46 = vsub.f32 %v3941_v2, %v4470_v28  ;;  %3341 = vmatpush3.bf16.msra.mxu1 %v3338_v26 }
  0x21   : > { %v3978_v47 = vsub.f32 %v3935_v62, %v4483_v29  ;;  %v4476_v54 = vand.u32 4294901760, %v3960_v25  ;;  %v3995_v0 = vsub.f32 %v3951_v4, %v4477_v36  ;;  %v4482_v60 = vand.u32 4294901760, %v3984_v55  ;;  %p3603_p13 = pneg %p3602_p12 }
  0x22   : > { %v406_v58 = vsub.f32 %v3890_v41, %v405_v50  ;;  %v416_v59 = vsub.f32 %v3893_v43, %v415_v51  ;;  %v3342_v8 = vpack.c.bf16 %v1012_v38, %v1005_v30  ;;  %v1026_v27 = vand.u32 4294901760, %v1025_v46 }
  0x23   : > { %v4479_v24 = vand.u32 4294901760, %v3995_v0  ;;  %v4015_v1 = vsub.f32 %v3960_v25, %v4476_v54  ;;  %v4495_v7 = vand.u32 4294901760, %v3887_v40  ;;  %v4497_v14 = vand.u32 4294901760, %v3935_v62  ;;  %v876_v40 = vld [vmem:[%s4466_s4 + $0x70] sm:$0xff] }
  0x24   : > { %v407_v5 = vand.u32 4294901760, %v406_v58  ;;  %v417_v6 = vand.u32 4294901760, %v416_v59  ;;  %v1019_v58 = vand.u32 4294901760, %v1018_v31  ;;  %v3990_v59 = vsub.f32 %v3946_v3, %v4481_v35  ;;  %3343 = vmatprep.subr.bf16.mxu1 %v3342_v8 }
  0x25   : > { %v4480_v31 = vand.u32 4294901760, %v3978_v47  ;;  %v1046_v54 = vsub.f32 %v3995_v0, %v4479_v24  ;;  %v4484_v36 = vand.u32 4294901760, %v4015_v1  ;;  %3345 = vmatpush3.bf16.msra.mxu1 %v3342_v8  ;;  %v4488_v24 = vand.u32 4294901760, %v4021_v48 }
  0x26   : > { %2930 = vmatprep.mubr.f32.mxu0 %v407_v5  ;;  %v4000_v5 = vld [vmem:[%s4466_s4 + $0x58] sm:$0xff]  ;;  %v4478_v28 = vand.u32 4294901760, %v3990_v59  ;;  %v3346_v26 = vpack.c.bf16 %v1026_v27, %v1019_v58  ;;  %v4038_v58 = vsub.f32 %v3984_v55, %v4482_v60  ;;  %v3278_v27 = vpack.c.bf16 %v3827_v16, %v3818_v13 }
  0x27   : > { %2931 = vmatmul.mubr.f32.vlgmr.msra.gmra.mrb[0].mxu0 %v417_v6  ;;  %v3274_v6 = vpack.c.bf16 %v3816_v12, %v3814_v11  ;;  %v1032_v30 = vsub.f32 %v3978_v47, %v4480_v31  ;;  %v4485_v38 = vand.u32 4294901760, %v4000_v5  ;;  %v1047_v35 = vand.u32 4294901760, %v1046_v54 }
  0x28   : > { %3269 = vmatpush3.bf16.msra.mxu0 %v3266_v42  ;;  %2941 = vmatprep.mubr.f32.mxu0 %v3866_v33  ;;  %v4005_v42 = vld [vmem:[%s4466_s4 + $0x60] sm:$0xff]  ;;  %v1039_v23 = vsub.f32 %v3990_v59, %v4478_v28  ;;  %v1053_v60 = vsub.f32 %v4015_v1, %v4484_v36  ;;  %v1059_v29 = vand.u32 4294901760, %v4038_v58  ;;  %v4106_v11 = vpack.c.bf16 %v889_v22, %v886_v9 }
  0x29   : > { %3271 = vmatprep.subr.bf16.mxu0 %v3270_v63  ;;  %v4486_v46 = vand.u32 4294901760, %v4005_v42  ;;  %v4045_v28 = vsub.f32 %v4000_v5, %v4485_v38  ;;  %3347 = vmatprep.subr.bf16.mxu1 %v3346_v26  ;;  %v4494_v12 = vand.u32 4294901760, %v3873_v37  ;;  %v4502_v22 = vand.u32 4294901760, %v4000_v5 }
  0x2a   : > { %v1040_v31 = vand.u32 4294901760, %v1039_v23  ;;  %v4062_v23 = vsub.f32 %v4021_v48, %v4488_v24  ;;  %v1054_v36 = vand.u32 4294901760, %v1053_v60  ;;  %v1060_v38 = vsub.f32 %v4038_v58, %v1059_v29  ;;  %3349 = vmatpush3.bf16.msra.mxu1 %v3346_v26 }
  0x2b   : > { %v4491_v8 = vand.u32 4294901760, %v4045_v28  ;;  %v4113_v13 = vpack.c.bf16 %v4494_v12, %v892_v44  ;;  %v1569_v12 = vld [vmem:[%s310_s8] sm:$0xff]  ;;  %vm2588_vm3 = vcmask 60416  }
  0x2c   : > { %3273 = vmatpush3.bf16.msra.mxu0 %v3270_v63  ;;  %v1033_v63 = vand.u32 4294901760, %v1032_v30  ;;  %v4057_v30 = vsub.f32 %v4005_v42, %v4486_v46  ;;  %v1080_v24 = vand.u32 4294901760, %v4062_v23  ;;  %v1061_v53 = vand.u32 4294901760, %v1060_v38 }
  0x2d   : > { %3275 = vmatprep.subr.bf16.mxu0 %v3274_v6  ;;  %v1067_v46 = vsub.f32 %v4045_v28, %v4491_v8 }
  0x2e   : > { %v3350_v54 = vpack.c.bf16 %v1040_v31, %v1033_v63  ;;  %v1073_v57 = vand.u32 4294901760, %v4057_v30  ;;  %v1081_v31 = vsub.f32 %v4062_v23, %v1080_v24 }
  0x2f   : > { %2942 = vmatmul.mubr.f32.vlgmr.msra.gmra.mrb[0].mxu0 %v3868_v34  ;;  %v1068_v49 = vand.u32 4294901760, %v1067_v46  ;;  %v2742_v46 = vld [vmem:[%s4465_s3] ss:$0 sm:$0xff] }
  0x30   : > { %3277 = vmatpush3.bf16.msra.mxu0 %v3274_v6  ;;  %2952 = vmatprep.mubr.f32.mxu0 %v3890_v41  ;;  %v3354_v6 = vpack.c.bf16 %v1054_v36, %v1047_v35  ;;  %v1074_v60 = vsub.f32 %v4057_v30, %v1073_v57  ;;  %v1082_v8 = vand.u32 4294901760, %v1081_v31  ;;  %v3290_v35 = vpack.c.bf16 %v433_v19, %v426_v18  ;;  %v877_v41 = vld [vmem:[%s4466_s4 + $0x78] sm:$0xff] }
  0x31   : > { %3279 = vmatprep.subr.bf16.mxu0 %v3278_v27  ;;  %3351 = vmatprep.subr.bf16.mxu1 %v3350_v54  ;;  %v3358_v26 = vpack.c.bf16 %v1068_v49, %v1061_v53  ;;  %v3294_v49 = vpack.c.bf16 %v447_v21, %v440_v20  ;;  %v4499_v18 = vand.u32 4294901760, %v3951_v4  ;;  %v4500_v19 = vand.u32 4294901760, %v3960_v25 }
  0x32   : > { %3353 = vmatpush3.bf16.msra.mxu1 %v3350_v54  ;;  %v1075_v63 = vand.u32 4294901760, %v1074_v60  ;;  %v4501_v21 = vand.u32 4294901760, %v3984_v55  ;;  %v931_v44 = vand.u32 4294901760, %v877_v41  ;;  %v3370_v55 = vpack.c.bf16 %v3882_v39, %v3832_v17 }
  0x33   : > { %3355 = vmatprep.subr.bf16.mxu1 %v3354_v6  ;;  %v4138_v20 = vpack.c.bf16 %v4500_v19, %v4499_v18  ;;  %v1570_v18 = vld [vmem:[%s310_s8 + $0x8] sm:$0xff]  ;;  %s3604_s8 = sshll.u32 %s3699_s29, 4  ;;  %s3605_s8 = int_to_ptr.vmem [resolvable:$false] %s3604_s8 }
  0x34   : > { %3281 = vmatpush3.bf16.msra.mxu0 %v3278_v27  ;;  %v3362_v36 = vpack.c.bf16 %v1082_v8, %v1075_v63  ;;  %v4146_v32 = vpack.c.bf16 %v4502_v22, %v4501_v21  ;;  %v3374_v63 = vpack.c.bf16 %v3917_v56, %v3908_v52  ;;  %v3382_v22 = vpack.c.bf16 %v3990_v59, %v3978_v47  ;;  %s3606_s19 = scalar_lea.vmem %s3605_s8, 256  ;;  %p3607_p0 = scmp.lt.s32.totalorder %s4370_s16, %s3605_s8 }
  0x35   : > { %3283 = vmatprep.subr.bf16.mxu0 %v3810_v10  ;;  %p3608_p1 = scmp.lt.s32.totalorder %s3606_s19, %s3600_s23 }
  0x36   : > { %3357 = vmatpush3.bf16.msra.mxu1 %v3354_v6 }
  0x37   : > { %2953 = vmatmul.mubr.f32.vlgmr.msra.gmra.mrb[0].mxu0 %v3893_v43  ;;  %3359 = vmatprep.subr.bf16.mxu1 %v3358_v26  ;;  %v928_v43 = vand.u32 4294901760, %v876_v40  ;;  %p3609_p2 = por %p3608_p1, %p3607_p0 }
  0x38   : > { %3285 = vmatpush3.bf16.msra.mxu0 %v3810_v10  ;;  %2963 = vmatprep.mubr.f32.mxu0 %v405_v50 }
  0x39   : > { %3287 = vmatprep.subr.bf16.mxu0 %v3825_v15  ;;  %v4180_v5 = vpack.c.bf16 %v931_v44, %v928_v43  ;;  %p3610_p3 = pnand %p3609_p2, %p3603_p13 }
  0x3a   : > { %3361 = vmatpush3.bf16.msra.mxu1 %v3358_v26 }
  0x3b   : > { %3363 = vmatprep.subr.bf16.mxu1 %v3362_v36 }
  0x3c   : > { %3289 = vmatpush3.bf16.msra.mxu0 %v3825_v15 }
  0x3d   : > { %3291 = vmatprep.subr.bf16.mxu0 %v3290_v35 }
  0x3e   : > { %3365 = vmatpush3.bf16.msra.mxu1 %v3362_v36 }
  0x3f   : > { %2964 = vmatmul.mubr.f32.vlgmr.msra.gmra.mrb[0].mxu0 %v415_v51 }
  0x40   : > { %3293 = vmatpush3.bf16.msra.mxu0 %v3290_v35  ;;  %2974 = vmatprep.mubr.f32.mxu0 %v3866_v33 }
  0x41   : > { %3295 = vmatprep.subr.bf16.mxu0 %v3294_v49 }
  0x44   : > { %3297 = vmatpush3.bf16.msra.mxu0 %v3294_v49 }
  0x45   : > { %3299 = vmatprep.subr.bf16.mxu0 %v3810_v10 }
  0x47   : > { %2975 = vmatmul.mubr.f32.vlgmr.msra.gmra.mrb[0].mxu0 %v3868_v34 }
  0x48   : > { %3301 = vmatpush3.bf16.msra.mxu0 %v3810_v10  ;;  %2985 = vmatprep.mubr.f32.mxu0 %v3866_v33  ;;  %v4496_v10 = vand.u32 4294901760, %v3899_v45  ;;  %v4503_v33 = vand.u32 4294901760, %v4005_v42  ;;  %v4166_v45 = vsub.f32 %v876_v40, %v928_v43  ;;  %v3696_v42 = vmov 0.0  }
  0x49   : > { %3303 = vmatprep.subr.bf16.mxu0 %v3825_v15  ;;  %v3394_v40 = vpack.c.bf16 %v4062_v23, %v4057_v30  ;;  %v4506_v43 = vand.u32 4294901760, %v3882_v39 }
  0x4a   : > { %v4122_v9 = vpack.c.bf16 %v4496_v10, %v4495_v7  ;;  %v1087_v50 = vand.u32 4294901760, %v4166_v45  ;;  %v3378_v7 = vpack.c.bf16 %v3941_v2, %v3930_v61 }
  0x4c   : > { %3305 = vmatpush3.bf16.msra.mxu0 %v3825_v15  ;;  %v4498_v15 = vand.u32 4294901760, %v3946_v3  ;;  %v1088_v53 = vsub.f32 %v4166_v45, %v1087_v50 }
  0x4d   : > { %3307 = vmatprep.subr.bf16.mxu0 %v4106_v11 }
  0x4e   : > { %v4130_v16 = vpack.c.bf16 %v4498_v15, %v4497_v14  ;;  %v1089_v3 = vand.u32 4294901760, %v1088_v53  ;;  %v3697_v14 = vmov 0   ;;  %v4507_v53 = vand.u32 4294901760, %v3908_v52 }
  0x4f   : > { %2986 = vmatmul.mubr.f32.vlgmr.msra.gmra.mrb[0].mxu0 %v3868_v34  ;;  %v4504_v34 = vand.u32 4294901760, %v4021_v48  ;;  %v4168_v48 = vsub.f32 %v877_v41, %v931_v44  ;;  %3591 = vset.pattern.permute.xlu0 %v3697_v14  ;;  %v4505_v41 = vand.u32 4294901760, %v3832_v17  ;;  %v4510_v17 = vand.u32 4294901760, %v3941_v2 }
  0x50   : > { %3309 = vmatpush3.bf16.msra.mxu0 %v4106_v11  ;;  %1573 = vperm.xlu0 %3591, %v1569_v12   ;;  %v4512_v52 = vand.u32 4294901760, %v3990_v59 }
  0x51   : > { %3311 = vmatprep.subr.bf16.mxu0 %v4113_v13  ;;  %v4154_v37 = vpack.c.bf16 %v4504_v34, %v4503_v33  ;;  %v1094_v51 = vand.u32 4294901760, %v4168_v48  ;;  %v3398_v38 = vpack.c.bf16 %v4168_v48, %v4166_v45  ;;  %v3386_v33 = vpack.c.bf16 %v4015_v1, %v3995_v0 }
  0x52   : > { %v3390_v34 = vpack.c.bf16 %v4045_v28, %v4038_v58  ;;  %v3434_v44 = vpack.c.bf16 %v4506_v43, %v4505_v41 }
  0x53   : > { %v1095_v62 = vsub.f32 %v4168_v48, %v1094_v51 }
  0x54   : > { %3313 = vmatpush3.bf16.msra.mxu0 %v4113_v13  ;;  %1578 = vperm.xlu0 %3591, %v1570_v18  }
  0x55   : > { %3315 = vmatprep.subr.bf16.mxu0 %v4122_v9  ;;  %v1096_v4 = vand.u32 4294901760, %v1095_v62  ;;  %v4508_v62 = vand.u32 4294901760, %v3917_v56  ;;  %v4513_v56 = vand.u32 4294901760, %v3995_v0 }
  0x57   : > { %v3366_v25 = vpack.c.bf16 %v1096_v4, %v1089_v3  ;;  %v3438_v3 = vpack.c.bf16 %v4508_v62, %v4507_v53  ;;  %v4509_v4 = vand.u32 4294901760, %v3930_v61  ;;  %v4515_v61 = vand.u32 4294901760, %v4045_v28 }
  0x58   : > { %3317 = vmatpush3.bf16.msra.mxu0 %v4122_v9 }
  0x59   : > { %3319 = vmatprep.subr.bf16.mxu0 %v4130_v16  ;;  %3367 = vmatprep.subr.bf16.mxu1 %v3366_v25  ;;  %v3442_v39 = vpack.c.bf16 %v4510_v17, %v4509_v4  ;;  %v3454_v2 = vpack.c.bf16 %v4515_v61, %v1059_v29  ;;  %v2743_v29 = vld [vmem:[%s4467_s5] ss:$0 sm:$0xff] }
  0x5a   : > { %3369 = vmatpush3.bf16.msra.mxu1 %v3366_v25  ;;  %v4511_v25 = vand.u32 4294901760, %v3978_v47  ;;  %v3458_v47 = vpack.c.bf16 %v1080_v24, %v1073_v57 }
  0x5b   : > { %3371 = vmatprep.subr.bf16.mxu1 %v3370_v55 }
  0x5c   : > { %3321 = vmatpush3.bf16.msra.mxu0 %v4130_v16 }
  0x5d   : > { %3323 = vmatprep.subr.bf16.mxu0 %v4138_v20 }
  0x60   : > { %3325 = vmatpush3.bf16.msra.mxu0 %v4138_v20 }
  0x61   : > { %3327 = vmatprep.subr.bf16.mxu0 %v4146_v32 }
  0x64   : > { %3329 = vmatpush3.bf16.msra.mxu0 %v4146_v32 }
  0x65   : > { %3331 = vmatprep.subr.bf16.mxu0 %v4154_v37 }
  0x68   : > { %3333 = vmatpush3.bf16.msra.mxu0 %v4154_v37 }
  0x69   : > { %3335 = vmatprep.subr.bf16.mxu0 %v4180_v5 }
  0x6c   : > { %3337 = vmatpush3.bf16.msra.mxu0 %v4180_v5 }
  0x6d   : > { %3198 = vmatprep.subr.mxu0 %v3696_v42 }
  0xcf   : > { %v1574_v28 = vpop.permute.xlu0 %1573 }
  0xd3   : > { %v1579_v30 = vpop.permute.xlu0 %1578 }
 0x122   : > { %v2987_v27 = vpop.f32.mrb[0].mxu0 }
 0x123   : > { %v3498_v8 = vadd.f32 %v2987_v27, %v2742_v46  ;;  %v852_v54 = vpop.f32.mrb[1].mxu0 }
 0x124   : > { %v3499_v6 = vadd.f32 %v2742_v46, %v852_v54 }
 0x125   : > { %v4190_v60 = vand.u32 4294901760, %v3498_v8 }
 0x126   : > { %v4192_v31 = vand.u32 4294901760, %v3499_v6 }
 0x127   : > { %v4195_v26 = vsub.f32 %v3498_v8, %v4190_v60 }
 0x128   : > { %v4200_v35 = vsub.f32 %v3499_v6, %v4192_v31  ;;  %3055 = vmatprep.mubr.f32.mxu1 %v4192_v31 }
 0x129   : > { %v4204_v36 = vand.u32 4294901760, %v4195_v26  ;;  %3056 = vmatmul.mubr.f32.vlgmr.msra.gmra.mrb[0].mxu1 %v4190_v60 }
 0x12a   : > { %3373 = vmatpush3.bf16.msra.mxu1 %v3370_v55  ;;  %3090 = vmatprep.mubr.f32.mxu1 %v4200_v35  ;;  %v4214_v49 = vand.u32 4294901760, %v4200_v35  ;;  %v3446_v55 = vpack.c.bf16 %v4512_v52, %v4511_v25 }
 0x12b   : > { %3375 = vmatprep.subr.bf16.mxu1 %v3374_v63  ;;  %v979_v10 = vsub.f32 %v4195_v26, %v4204_v36 }
 0x12c   : > { %v969_v15 = vsub.f32 %v4200_v35, %v4214_v49 }
 0x12d   : > { %v4224_v21 = vand.u32 4294901760, %v979_v10 }
 0x12e   : > { %3377 = vmatpush3.bf16.msra.mxu1 %v3374_v63  ;;  %v4222_v19 = vand.u32 4294901760, %v969_v15 }
 0x12f   : > { %3379 = vmatprep.subr.bf16.mxu1 %v3378_v7 }
 0x130   : > { %3020 = vmatprep.mubr.f32.mxu0 %v4222_v19 }
 0x131   : > { %3021 = vmatmul.mubr.f32.vlgmr.msra.gmra.mrb[2].mxu0 %v4224_v21 }
 0x132   : > { %3381 = vmatpush3.bf16.msra.mxu1 %v3378_v7  ;;  %3199 = vmatpush3.msra.mxu0 %v4192_v31 }
 0x133   : > { %3383 = vmatprep.subr.bf16.mxu1 %v3382_v22  ;;  %3203 = vmatprep.subr.mxu0 %v3696_v42 }
 0x134   : > { %3200 = vmatprep.mubr.msk.f32.mxu0 %vm3698_vm1, %v3696_v42 }
 0x136   : > { %3385 = vmatpush3.bf16.msra.mxu1 %v3382_v22 }
 0x137   : > { %3387 = vmatprep.subr.bf16.mxu1 %v3386_v33 }
 0x13a   : > { %3389 = vmatpush3.bf16.msra.mxu1 %v3386_v33 }
 0x13b   : > { %3391 = vmatprep.subr.bf16.mxu1 %v3390_v34 }
 0x13e   : > { %3393 = vmatpush3.bf16.msra.mxu1 %v3390_v34 }
 0x13f   : > { %3395 = vmatprep.subr.bf16.mxu1 %v3394_v40 }
 0x142   : > { %3397 = vmatpush3.bf16.msra.mxu1 %v3394_v40 }
 0x143   : > { %3399 = vmatprep.subr.bf16.mxu1 %v3398_v38 }
 0x146   : > { %3401 = vmatpush3.bf16.msra.mxu1 %v3398_v38  ;;  %v4514_v38 = vand.u32 4294901760, %v4015_v1  ;;  %v3462_v1 = vpack.c.bf16 %v1094_v51, %v1087_v50 }
 0x147   : > { %3403 = vmatprep.subr.bf16.mxu1 %v4106_v11 }
 0x148   : > { %v3450_v46 = vpack.c.bf16 %v4514_v38, %v4513_v56 }
 0x149   : > { %3091 = vmatmul.mubr.f32.vlgmr.msra.gmra.mrb[0].mxu1 %v4195_v26 }
 0x14a   : > { %3405 = vmatpush3.bf16.msra.mxu1 %v4106_v11  ;;  %3125 = vmatprep.mubr.f32.mxu1 %v4214_v49 }
 0x14b   : > { %3407 = vmatprep.subr.bf16.mxu1 %v4113_v13 }
 0x14e   : > { %3409 = vmatpush3.bf16.msra.mxu1 %v4113_v13 }
 0x14f   : > { %3411 = vmatprep.subr.bf16.mxu1 %v4122_v9 }
 0x152   : > { %3413 = vmatpush3.bf16.msra.mxu1 %v4122_v9 }
 0x153   : > { %3415 = vmatprep.subr.bf16.mxu1 %v4130_v16 }
 0x156   : > { %3417 = vmatpush3.bf16.msra.mxu1 %v4130_v16 }
 0x157   : > { %3419 = vmatprep.subr.bf16.mxu1 %v4138_v20 }
 0x15a   : > { %3421 = vmatpush3.bf16.msra.mxu1 %v4138_v20 }
 0x15b   : > { %3423 = vmatprep.subr.bf16.mxu1 %v4146_v32 }
 0x15e   : > { %3425 = vmatpush3.bf16.msra.mxu1 %v4146_v32 }
 0x15f   : > { %3427 = vmatprep.subr.bf16.mxu1 %v4154_v37 }
 0x162   : > { %3429 = vmatpush3.bf16.msra.mxu1 %v4154_v37 }
 0x163   : > { %3431 = vmatprep.subr.bf16.mxu1 %v4180_v5 }
 0x166   : > { %3433 = vmatpush3.bf16.msra.mxu1 %v4180_v5 }
 0x167   : > { %3435 = vmatprep.subr.bf16.mxu1 %v3434_v44 }
 0x169   : > { %3126 = vmatmul.mubr.f32.vlgmr.msra.gmra.mrb[0].mxu1 %v4204_v36 }
 0x16a   : > { %3437 = vmatpush3.bf16.msra.mxu1 %v3434_v44  ;;  %3160 = vmatprep.mubr.f32.mxu1 %v4192_v31 }
 0x16b   : > { %3439 = vmatprep.subr.bf16.mxu1 %v3438_v3 }
 0x16e   : > { %3441 = vmatpush3.bf16.msra.mxu1 %v3438_v3 }
 0x16f   : > { %3443 = vmatprep.subr.bf16.mxu1 %v3442_v39 }
 0x172   : > { %3445 = vmatpush3.bf16.msra.mxu1 %v3442_v39 }
 0x173   : > { %3447 = vmatprep.subr.bf16.mxu1 %v3446_v55 }
 0x176   : > { %3449 = vmatpush3.bf16.msra.mxu1 %v3446_v55 }
 0x177   : > { %3451 = vmatprep.subr.bf16.mxu1 %v3450_v46 }
 0x17a   : > { %3453 = vmatpush3.bf16.msra.mxu1 %v3450_v46 }
 0x17b   : > { %3455 = vmatprep.subr.bf16.mxu1 %v3454_v2 }
 0x17e   : > { %3457 = vmatpush3.bf16.msra.mxu1 %v3454_v2 }
 0x17f   : > { %3459 = vmatprep.subr.bf16.mxu1 %v3458_v47 }
 0x182   : > { %3461 = vmatpush3.bf16.msra.mxu1 %v3458_v47 }
 0x183   : > { %3463 = vmatprep.subr.bf16.mxu1 %v3462_v1 }
 0x186   : > { %3465 = vmatpush3.bf16.msra.mxu1 %v3462_v1 }
 0x187   : > { %3467 = vmatprep.subr.bf16.mxu1 %v4106_v11 }
 0x189   : > { %3161 = vmatmul.mubr.f32.vlgmr.msra.gmra.mrb[0].mxu1 %v4190_v60 }
 0x18a   : > { %3469 = vmatpush3.bf16.msra.mxu1 %v4106_v11  ;;  %3195 = vmatprep.mubr.f32.mxu1 %v4192_v31 }
 0x18b   : > { %3471 = vmatprep.subr.bf16.mxu1 %v4113_v13 }
 0x18e   : > { %3473 = vmatpush3.bf16.msra.mxu1 %v4113_v13 }
 0x18f   : > { %3475 = vmatprep.subr.bf16.mxu1 %v4122_v9 }
 0x192   : > { %3477 = vmatpush3.bf16.msra.mxu1 %v4122_v9 }
 0x193   : > { %3479 = vmatprep.subr.bf16.mxu1 %v4130_v16 }
 0x196   : > { %3481 = vmatpush3.bf16.msra.mxu1 %v4130_v16 }
 0x197   : > { %3483 = vmatprep.subr.bf16.mxu1 %v4138_v20 }
 0x19a   : > { %3485 = vmatpush3.bf16.msra.mxu1 %v4138_v20 }
 0x19b   : > { %3487 = vmatprep.subr.bf16.mxu1 %v4146_v32 }
 0x19e   : > { %3489 = vmatpush3.bf16.msra.mxu1 %v4146_v32 }
 0x19f   : > { %3491 = vmatprep.subr.bf16.mxu1 %v4154_v37 }
 0x1a2   : > { %3493 = vmatpush3.bf16.msra.mxu1 %v4154_v37 }
 0x1a3   : > { %3495 = vmatprep.subr.bf16.mxu1 %v4180_v5 }
 0x1a6   : > { %3497 = vmatpush3.bf16.msra.mxu1 %v4180_v5 }
 0x1a9   : > { %3196 = vmatmul.mubr.f32.vlgmr.msra.gmra.mrb[0].mxu1 %v4190_v60 }
 0x204   : > { %v3022_v57 = vpop.f32.mrb[2].mxu0 }
 0x205   : > { %v972_v24 = vpop.f32.mrb[3].mxu0  ;;  %v983_v59 = vadd.f32 %v3022_v57, %v2743_v29 }
 0x206   : > { %v973_v0 = vadd.f32 %v2743_v29, %v972_v24 }
 0x27c   : > { %v3197_v58 = vpop.f32.mrb[0].mxu1 }
 0x27d   : > { %v3501_v23 = vadd.f32 %v3197_v58, %v983_v59  ;;  %v1559_v11 = vpop.f32.mrb[1].mxu1 }
 0x27e   : > { %v3503_v13 = vadd.f32 %v1559_v11, %v973_v0 }
 0x27f   : > { %v1582_v9 = vadd.f32 %v3501_v23, %v1579_v30 }
 0x280   : > { %v1581_v16 = vadd.f32 %v3503_v13, %v1574_v28 }
 0x281   : > { %v1589_v20 = vrot.slane %v1582_v9, 4 }
 0x282   : > { %v1583_v32 = vrot.slane %v1581_v16, 4 }
 0x283   : > { %v1590_v37 = vmax.f32 %v1582_v9, %v1589_v20 }
 0x284   : > { %v1584_v45 = vmax.f32 %v1581_v16, %v1583_v32 }
 0x285   : > { %v1591_v48 = vrot.slane %v1590_v37, 2 }
 0x286   : > { %v1585_v50 = vrot.slane %v1584_v45, 2 }
 0x287   : > { %v1592_v51 = vmax.f32 %v1590_v37, %v1591_v48 }
 0x288   : > { %v1586_v5 = vmax.f32 %v1584_v45, %v1585_v50 }
 0x289   : > { %v1593_v27 = vrot.slane %v1592_v51, 1 }
 0x28a   : > { %v1587_v8 = vrot.slane %v1586_v5, 1 }
 0x28b   : > { %v1594_v54 = vmax.f32 %v1592_v51, %v1593_v27 }
 0x28c   : > { %v1588_v6 = vmax.f32 %v1586_v5, %v1587_v8 }
 0x28d   : > { %v1596_v63 = vsub.f32 %v1582_v9, %v1594_v54 }
 0x28e   : > { %v1595_v12 = vsub.f32 %v1581_v16, %v1588_v6 }
 0x28f   : > { %v1599_v7 = vmul.f32 1.442695, %v1596_v63 }
 0x290   : > { %v1597_v10 = vmul.f32 1.442695, %v1595_v12 }
 0x291   : > { %3592 = vpow2.f32 %v1599_v7 }
 0x292   : > { %3594 = vpow2.f32 %v1597_v10 }
 0x29b   : > { %v3593_v14 = vpop.eup %3592 }
 0x29c   : > { %v3595_v15 = vpop.eup %3594  ;;  %v1607_v18 = vrot.slane %v3593_v14, 4 }
 0x29d   : > { %v1601_v22 = vrot.slane %v3595_v15, 4 }
 0x29e   : > { %v1608_v33 = vadd.f32 %v3593_v14, %v1607_v18 }
 0x29f   : > { %v1602_v34 = vadd.f32 %v3595_v15, %v1601_v22 }
 0x2a0   : > { %v1609_v40 = vrot.slane %v1608_v33, 2 }
 0x2a1   : > { %v1603_v41 = vrot.slane %v1602_v34, 2 }
 0x2a2   : > { %v1610_v43 = vadd.f32 %v1609_v40, %v1608_v33 }
 0x2a3   : > { %v1604_v44 = vadd.f32 %v1603_v41, %v1602_v34 }
 0x2a4   : > { %v1611_v53 = vrot.slane %v1610_v43, 1 }
 0x2a5   : > { %v1605_v62 = vrot.slane %v1604_v44, 1 }
 0x2a6   : > { %v1612_v3 = vadd.f32 %v1611_v53, %v1610_v43 }
 0x2a7   : > { %v1606_v4 = vadd.f32 %v1605_v62, %v1604_v44 }
 0x2a8   : > { %3596 = vrcp.f32 %v1612_v3 }
 0x2a9   : > { %3598 = vrcp.f32 %v1606_v4 }
 0x2b2   : > { %v3597_v17 = vpop.eup %3596 }
 0x2b3   : > { %v3599_v39 = vpop.eup %3598  ;;  %v1616_v25 = vmul.f32 %v3597_v17, %v1612_v3 }
 0x2b4   : > { %v1615_v52 = vmul.f32 %v3599_v39, %v1606_v4 }
 0x2b5   : > { %v1618_v56 = vsub.f32 2.0, %v1616_v25 }
 0x2b6   : > { %v1617_v55 = vsub.f32 2.0, %v1615_v52 }
 0x2b7   : > { %v1620_v61 = vmul.f32 %v3597_v17, %v1618_v56 }
 0x2b8   : > { %v1619_v38 = vmul.f32 %v3599_v39, %v1617_v55 }
 0x2b9   : > { %v1622_v2 = vmul.f32 %v3593_v14, %v1620_v61 }
 0x2ba   : > { %v1621_v46 = vmul.f32 %v3595_v15, %v1619_v38 }
 0x2bc   : > { %1623 = vxpose.xlu1.b32.start.end [1/1] (short) (narrow) %v1621_v46, 8 }
 0x2c0   : > { %2105 = vxpose.xlu1.b32.start.end [1/1] (short) (narrow) %v1622_v2, 8 }
 0x33c   : > { %v1639_v47 = vpop.trf.xlu1 }
 0x33d   : > { %v1657_v1 = vsel %vm1655_vm2, %v1639_v47, 0  ;;  %2589 = vst.msk [vmem:[%s4321_s15] sm:$0xf] %vm2588_vm3, %v1639_v47 }
 0x33e   : > { %v1725_v57 = vand.u32 4294901760, %v1657_v1 }
 0x340   : > { %v1726_v24 = vsub.f32 %v1657_v1, %v1725_v57  ;;  %v2121_v28 = vpop.trf.xlu1 }
 0x341   : > { %2590 = vst.msk [vmem:[%s4321_s15 + $0x4] sm:$0xf] %vm2588_vm3, %v2121_v28 }
 0x342   : > { %v1727_v29 = vand.u32 4294901760, %v1726_v24 }
 0x344   : > { %v1728_v59 = vsub.f32 %v1726_v24, %v1727_v29 }
 0x346   : > { %v1729_v0 = vand.u32 4294901760, %v1728_v59 }
 0x348   : > { %3201 = vmatmul.mubr.f32.vlgmr.msra.gmra.mrb[4].mxu0 %v1729_v0 }
 0x349   : > { %3204 = vmatpush3.msra.mxu0 %v4222_v19  ;;  %3205 = vmatprep.mubr.msk.f32.mxu0 %vm3698_vm1, %v3696_v42  ;;  %v2138_v19 = vsel %vm1655_vm2, %v2121_v28, 0 }
 0x34a   : > { %3208 = vmatprep.subr.mxu0 %v3696_v42 }
 0x350   : > { %3206 = vmatmul.mubr.f32.vlgmr.msra.gmra.mrb[4].mxu0 %v1725_v57 }
 0x351   : > { %3209 = vmatpush3.msra.mxu0 %v4200_v35  ;;  %3210 = vmatprep.mubr.msk.f32.mxu0 %vm3698_vm1, %v3696_v42  ;;  %v2206_v35 = vand.u32 4294901760, %v2138_v19 }
 0x352   : > { %3213 = vmatprep.subr.mxu0 %v3696_v42 }
 0x353   : > { %v2207_v58 = vsub.f32 %v2138_v19, %v2206_v35 }
 0x355   : > { %v2208_v30 = vand.u32 4294901760, %v2207_v58 }
 0x357   : > { %v2209_v23 = vsub.f32 %v2207_v58, %v2208_v30 }
 0x358   : > { %3211 = vmatmul.mubr.f32.vlgmr.msra.gmra.mrb[4].mxu0 %v1726_v24 }
 0x359   : > { %3214 = vmatpush3.msra.mxu0 %v4192_v31  ;;  %3215 = vmatprep.mubr.msk.f32.mxu0 %vm3698_vm1, %v3696_v42 }
 0x35a   : > { %3218 = vmatprep.subr.mxu0 %v3696_v42 }
 0x360   : > { %3216 = vmatmul.mubr.f32.vlgmr.msra.gmra.mrb[4].mxu0 %v1727_v29 }
 0x361   : > { %3219 = vmatpush3.msra.mxu0 %v4214_v49  ;;  %3220 = vmatprep.mubr.msk.f32.mxu0 %vm3698_vm1, %v3696_v42  ;;  %v2210_v49 = vand.u32 4294901760, %v2209_v23 }
 0x362   : > { %3223 = vmatprep.subr.mxu0 %v3696_v42 }
 0x368   : > { %3221 = vmatmul.mubr.f32.vlgmr.msra.gmra.mrb[4].mxu0 %v1725_v57 }
 0x369   : > { %3224 = vmatpush3.msra.mxu0 %v4192_v31  ;;  %3225 = vmatprep.mubr.msk.f32.mxu0 %vm3698_vm1, %v3696_v42 }
 0x36a   : > { %3228 = vmatprep.subr.mxu0 %v3696_v42 }
 0x370   : > { %3226 = vmatmul.mubr.f32.vlgmr.msra.gmra.mrb[4].mxu0 %v1725_v57 }
 0x371   : > { %3229 = vmatpush3.msra.mxu0 %v4190_v60  ;;  %3230 = vmatprep.mubr.msk.f32.mxu0 %vm3698_vm1, %v3696_v42 }
 0x372   : > { %3233 = vmatprep.subr.mxu0 %v3696_v42 }
 0x374   : > { %3231 = vmatmul.mubr.f32.vlgmr.msra.gmra.mrb[6].mxu0 %v2210_v49 }
 0x375   : > { %3234 = vmatpush3.msra.mxu0 %v4224_v21  ;;  %3235 = vmatprep.mubr.msk.f32.mxu0 %vm3698_vm1, %v3696_v42 }
 0x376   : > { %3238 = vmatprep.subr.mxu0 %v3696_v42 }
 0x37c   : > { %3236 = vmatmul.mubr.f32.vlgmr.msra.gmra.mrb[6].mxu0 %v2206_v35 }
 0x37d   : > { %3239 = vmatpush3.msra.mxu0 %v4195_v26  ;;  %3240 = vmatprep.mubr.msk.f32.mxu0 %vm3698_vm1, %v3696_v42 }
 0x37e   : > { %3243 = vmatprep.subr.mxu0 %v3696_v42 }
 0x384   : > { %3241 = vmatmul.mubr.f32.vlgmr.msra.gmra.mrb[6].mxu0 %v2207_v58 }
 0x385   : > { %3244 = vmatpush3.msra.mxu0 %v4190_v60  ;;  %3245 = vmatprep.mubr.msk.f32.mxu0 %vm3698_vm1, %v3696_v42 }
 0x386   : > { %3248 = vmatprep.subr.mxu0 %v3696_v42 }
 0x38c   : > { %3246 = vmatmul.mubr.f32.vlgmr.msra.gmra.mrb[6].mxu0 %v2208_v30 }
 0x38d   : > { %3249 = vmatpush3.msra.mxu0 %v4204_v36  ;;  %3250 = vmatprep.mubr.msk.f32.mxu0 %vm3698_vm1, %v3696_v42 }
 0x38e   : > { %3253 = vmatprep.subr.mxu0 %v3696_v42 }
 0x394   : > { %3251 = vmatmul.mubr.f32.vlgmr.msra.gmra.mrb[6].mxu0 %v2206_v35 }
 0x395   : > { %3254 = vmatpush3.msra.mxu0 %v4190_v60  ;;  %3255 = vmatprep.mubr.msk.f32.mxu0 %vm3698_vm1, %v3696_v42 }
 0x39c   : > { %3256 = vmatmul.mubr.f32.vlgmr.msra.gmra.mrb[6].mxu0 %v2206_v35 }
 0x39d   : > { %3613 = shalt.err (!%p3610_p3)
}
 0x39e   : > { %s3614_s9 = scalar_lea.hbm %s4378_s21, 128  ;;  %s3618_s20 = scalar_lea.hbm %s4469_s7, 256 }
 0x39f   : > { %p3615_p4 = scmp.ne.s32.totalorder %s4378_s21, %s3614_s9  ;;  %p3619_p9 = scmp.lt.u32.totalorder %s4378_s21, %s4469_s7 }
 0x3a0   : > { %p3620_p10 = scmp.lt.u32.totalorder %s3618_s20, %s3614_s9  ;;  %p3622_p12 = scmp.lt.u32.totalorder %s3614_s9, %s4378_s21 }
 0x3a1   : > { %p3616_p7 = pnand %p3615_p4, %p3781_p5 }
 0x3a2   : > { %p3621_p11 = por %p3620_p10, %p3619_p9 }
 0x3a3   : > { %p3617_p8 = pneg %p3616_p7 }
 0x3a4   : > { %p3623_p13 = por %p3622_p12, %p3621_p11 }
 0x3a6   : > { %p3624_p0 = pnand %p3623_p13, %p3617_p8 }
 0x3a8   : > { %3627 = shalt.err (!%p3624_p0)
}
 0x3a9   : > { %s3700_s23 = smov 64   ;;  %s3701_s19 = smov 4  }
 0x3aa   : > { %3543 = dma.vmem_to_hbm [thread:$0]  (%p3781_p5), %s4370_s16, 128, %s4378_s21, %s2597_s22, %s3700_s23, %s3700_s23, %s3701_s19  }
 0x3ab   : > { %s292_s9 = scalar_lea.vmem [#allocation2], %s2736_s14  ;;  %s4416_s29 = scalar_lea.hbm %s4468_s6, %s2752_s17 }
 0x3ac   : > { %s2610_s15 = sshll.u32 %s292_s9, 4  ;;  %s2592_s16 = scalar_lea.sflag [#allocation3], %s4315_s13  ;;  %s4409_s15 = int_to_ptr.vmem [resolvable:$true] %s2610_s15 }
 0x3ad   : > { %s3628_s21 = scalar_lea.vmem %s4409_s15, 128  ;;  %s3702_s14 = smov [#allocation2]  }
 0x3ae   : > { %p3629_p1 = scmp.ne.s32.totalorder %s4409_s15, %s3628_s21  ;;  %s3632_s22 = sshll.u32 %s3702_s14, 4  ;;  %s3633_s22 = int_to_ptr.vmem [resolvable:$false] %s3632_s22 }
 0x3af   : > { %s3634_s28 = scalar_lea.vmem %s3633_s22, 256  ;;  %p3635_p4 = scmp.lt.s32.totalorder %s4409_s15, %s3633_s22 }
 0x3b0   : > { %p3630_p2 = pnand %p3629_p1, %p3781_p5  ;;  %p3636_p7 = scmp.lt.s32.totalorder %s3634_s28, %s3628_s21 }
 0x3b2   : > { %p3631_p3 = pneg %p3630_p2  ;;  %p3637_p8 = por %p3636_p7, %p3635_p4 }
 0x3b4   : > { %p3638_p9 = pnand %p3637_p8, %p3631_p3 }
 0x443   : > { %v2101_v42 = vpop.f32.mrb[4].mxu0 }
 0x444   : > { %2586 = vst [vmem:[%s292_s9] sm:$0xf] %v2101_v42  ;;  %v3227_v60 = vpop.f32.mrb[5].mxu0 }
 0x46f   : > { %v2582_v31 = vpop.f32.mrb[6].mxu0 }
 0x470   : > { %2587 = vst [vmem:[%s292_s9 + $0x4] sm:$0xf] %v2582_v31  ;;  %v3257_v26 = vpop.f32.mrb[7].mxu0 }
 0x471   : > { %3641 = shalt.err (!%p3638_p9)
}
 0x472   : > { %s3642_s17 = scalar_lea.hbm %s4416_s29, 128  ;;  %s3646_s18 = scalar_lea.hbm %s4468_s6, 256 }
 0x473   : > { %p3643_p10 = scmp.ne.s32.totalorder %s4416_s29, %s3642_s17  ;;  %p3647_p13 = scmp.lt.u32.totalorder %s4416_s29, %s4468_s6 }
 0x474   : > { %p3648_p0 = scmp.lt.u32.totalorder %s3646_s18, %s3642_s17  ;;  %p3650_p2 = scmp.lt.u32.totalorder %s3642_s17, %s4416_s29 }
 0x475   : > { %p3644_p11 = pnand %p3643_p10, %p3781_p5 }
 0x476   : > { %p3649_p1 = por %p3648_p0, %p3647_p13 }
 0x477   : > { %p3645_p12 = pneg %p3644_p11 }
 0x478   : > { %p3651_p3 = por %p3650_p2, %p3649_p1 }
 0x47a   : > { %p3652_p4 = pnand %p3651_p3, %p3645_p12 }
 0x47c   : > { %3655 = shalt.err (!%p3652_p4)
}
 0x47d   : > { %3542 = dma.vmem_to_hbm [thread:$0]  (%p3781_p5), %s4409_s15, 128, %s4416_s29, %s2592_s16, %s3700_s23, %s3700_s23, %s3701_s19  }
 0x47e PF: > { %p3553_p7 = scmp.ge.s32.totalorder %s3694_s27, 2  ;;  %s2641_s21 = sand.u32 1, %s3682_s24  }
 0x47f   : > { %s2642_s22 = scalar_lea.sflag [#allocation3], %s2641_s21 }
 0x480   : > { %p3547_p8 = pnand %p3553_p7, %p3785_p6 }
 0x482   : > { %3673 = dma.done.wait (!%p3547_p8), %s2642_s22, 128  }
 0x483   : > { %3675 = vsyncadd (!%p3547_p8), %s2642_s22, 4294967168  ;;  %s2651_s11 = scalar_lea.sflag [#allocation5], %s2641_s21 }
 0x484   : > { %3677 = dma.done.wait (!%p3547_p8), %s2651_s11, 128  }
 0x485   : > { %3679 = vsyncadd (!%p3547_p8), %s2651_s11, 4294967168  ;;  %p21_p5 = scmp.ge.s32.totalorder %s3768_s30, 4   ;;  %s4516_s24 = smov %s3686_s25 }
 0x486   : > { %s4517_s25 = smov %s3690_s26  ;;  %s4518_s26 = smov %s3779_s10 }
 0x487   : > { %s4519_s27 = smov %s3768_s30  ;;  %23 = sbr.rel (!%p21_p5) target bundleno = 5 (0x5), region = 99 }
 0x48e   :  { %2656 = vsyncpa [#allocation3], 1 }
 0x48f   :  { %2658 = vsyncpa [#allocation3 + $0x1], 1 }
 0x490   :  { %2659 = vsyncpa [#allocation5], 1 }
 0x491   :  { %2661 = vsyncpa [#allocation5 + $0x1], 1 }

</bundles_post_ra>
